<compile_context>
chip_gen: v7x
topology: tpu7x:2x2x1
jax: 0.10.0
libtpu: 0.0.40
codegen_flags: <defaults>
</compile_context>

<pallas_src>
import functools
import math

import jax
import jax.numpy as jnp
from jax.experimental import pallas as pl
from jax.experimental.pallas import tpu as pltpu


# ------------------------------ fused kernel --------------------------------

def _vsc_fused_kernel(*refs, n_enc_extra, n_dec_extra, latent_pad, c,
                      bias_offsets, bias_widths):
    """Inputs (in order): x, noise=[eps|eta], weights (fc1, fc1n..., heads,
       fc3, fc3n..., fc4), packed bias buffer.
       Outputs: mu, logvar, logspike, recon  (all lane-padded widths)."""
    mu_ref, logvar_ref, logspike_ref, recon_ref = refs[-4:]
    x_ref, noise_ref = refs[0], refs[1]
    bias_ref = refs[-5]
    w_refs = refs[2:-5]

    eps = noise_ref[:, :latent_pad]          # (TB, Lp)  lane-aligned slices
    eta = noise_ref[:, latent_pad:]          # (TB, Lp)

    layer = [0]

    def linear(h, relu):
        k = layer[0]
        layer[0] += 1
        w = w_refs[k][...]                                   # bf16, resident
        off, width = bias_offsets[k], bias_widths[k]
        b = bias_ref[:, off:off + width]                     # f32 (1, width)
        y = jnp.dot(h.astype(jnp.bfloat16), w,
                    preferred_element_type=jnp.float32) + b
        return jnp.maximum(y, 0.0) if relu else y

    # ---- encoder ----
    h = linear(x_ref[...], True)
    for _ in range(n_enc_extra):
        h = linear(h, True)
    heads = linear(h, False)                                 # (TB, 3*Lp)

    mu = heads[:, :latent_pad]
    logvar = heads[:, latent_pad:2 * latent_pad]
    logspike = jnp.minimum(heads[:, 2 * latent_pad:], 0.0)   # == -relu(-x)

    mu_ref[...] = mu
    logvar_ref[...] = logvar
    logspike_ref[...] = logspike

    # ---- reparameterize: z = sigmoid(c*(eta + exp(logspike) - 1)) * (eps*std + mu)
    std = jnp.exp(0.5 * logvar)
    gaussian = eps * std + mu
    selection = jax.nn.sigmoid(c * (eta + jnp.exp(logspike) - 1.0))
    z = selection * gaussian

    # ---- decoder ----
    h3 = linear(z, True)
    for _ in range(n_dec_extra):
        h3 = linear(h3, True)
    recon_ref[...] = jax.nn.sigmoid(linear(h3, False))


# --------------------------- parameter handling ------------------------------

def _init_linear(key, in_f, out_f):
    """PyTorch-style nn.Linear init; weight stored as (in, out), bias as (1, out)."""
    kw, kb = jax.random.split(key)
    bound = 1.0 / math.sqrt(in_f)
    w = jax.random.uniform(kw, (in_f, out_f), jnp.float32, -bound, bound)
    b = jax.random.uniform(kb, (1, out_f), jnp.float32, -bound, bound)
    return w, b


def init_vsc_params(key, input_sz, hidden_szs, latent_sz):
    n_layers = 6 + 2 * (len(hidden_szs) - 1)
    keys = list(jax.random.split(key, n_layers))
    params = {}
    params["fc1"] = _init_linear(keys.pop(0), input_sz, hidden_szs[0])
    params["fc1n"] = [
        _init_linear(keys.pop(0), hidden_szs[i], hidden_szs[i + 1])
        for i in range(len(hidden_szs) - 1)
    ]
    params["fc21"] = _init_linear(keys.pop(0), hidden_szs[-1], latent_sz)
    params["fc22"] = _init_linear(keys.pop(0), hidden_szs[-1], latent_sz)
    params["fc23"] = _init_linear(keys.pop(0), hidden_szs[-1], latent_sz)
    params["fc3"] = _init_linear(keys.pop(0), latent_sz, hidden_szs[-1])
    params["fc3n"] = [
        _init_linear(keys.pop(0), hidden_szs[-i - 1], hidden_szs[-i - 2])
        for i in range(len(hidden_szs) - 1)
    ]
    params["fc4"] = _init_linear(keys.pop(0), hidden_szs[0], input_sz)
    return params


def pack_vsc_params(params, lane=128):
    """One-time packing: lane-pad every dim to a multiple of 128, cast weights
    to bf16, fuse fc21/fc22/fc23 into one head layer, and concatenate all
    (f32) biases into a single lane-aligned buffer."""
    def rup(n):
        return ((n + lane - 1) // lane) * lane

    def pad_w(w, ip, op):
        return jnp.pad(w, ((0, ip - w.shape[0]),
                           (0, op - w.shape[1]))).astype(jnp.bfloat16)

    def pad_b(b, op):
        return jnp.pad(b, ((0, 0), (0, op - b.shape[1])))

    input_sz = params["fc1"][0].shape[0]
    hidden = [params["fc1"][0].shape[1]] + [w.shape[1] for (w, _) in params["fc1n"]]
    latent = params["fc21"][0].shape[1]
    in_pad, lat_pad = rup(input_sz), rup(latent)
    hp = [rup(h) for h in hidden]

    weights, biases = [], []
    # fc1
    weights.append(pad_w(params["fc1"][0], in_pad, hp[0]))
    biases.append(pad_b(params["fc1"][1], hp[0]))
    # fc1n
    for i, (w, b) in enumerate(params["fc1n"]):
        weights.append(pad_w(w, hp[i], hp[i + 1]))
        biases.append(pad_b(b, hp[i + 1]))
    # heads: [fc21 | fc22 | fc23], each lane-padded to lat_pad
    weights.append(jnp.concatenate(
        [pad_w(params[k][0], hp[-1], lat_pad) for k in ("fc21", "fc22", "fc23")],
        axis=1))
    biases.append(jnp.concatenate(
        [pad_b(params[k][1], lat_pad) for k in ("fc21", "fc22", "fc23")], axis=1))
    # fc3
    weights.append(pad_w(params["fc3"][0], lat_pad, hp[-1]))
    biases.append(pad_b(params["fc3"][1], hp[-1]))
    # fc3n
    for i, (w, b) in enumerate(params["fc3n"]):
        weights.append(pad_w(w, hp[-i - 1], hp[-i - 2]))
        biases.append(pad_b(b, hp[-i - 2]))
    # fc4
    weights.append(pad_w(params["fc4"][0], hp[0], in_pad))
    biases.append(pad_b(params["fc4"][1], in_pad))

    widths, offsets, acc = [], [], 0
    for b in biases:
        widths.append(int(b.shape[1]))
        offsets.append(acc)
        acc += int(b.shape[1])
    bias_all = jnp.concatenate(biases, axis=1)        # f32, (1, sum widths)

    meta = dict(
        n_enc_extra=len(params["fc1n"]),
        n_dec_extra=len(params["fc3n"]),
        latent_sz=latent, latent_pad=lat_pad,
        input_sz=input_sz, input_pad=in_pad,
        bias_offsets=tuple(offsets), bias_widths=tuple(widths),
    )
    return dict(weights=weights, bias=bias_all, meta=meta)


# --------------------------------- forward -----------------------------------

def vsc_forward(packed, x, noise_key, c=50.0, batch_tile=256):
    """batch_tile guidance: v6e 512-1024, v5e 128-512, v7x 128-256 (64 MiB VMEM)."""
    weights, bias_all, meta = packed["weights"], packed["bias"], packed["meta"]
    B = x.shape[0]
    L, Lp = meta["latent_sz"], meta["latent_pad"]
    D, Dp = meta["input_sz"], meta["input_pad"]

    # eps ~ N(0,1), eta ~ U[0,1), same shapes/stream as the reference, then
    # zero-padded to the lane width and packed into one operand [eps | eta].
    k_eps, k_eta = jax.random.split(noise_key)
    eps = jax.random.normal(k_eps, (B, L), jnp.float32)
    eta = jax.random.uniform(k_eta, (B, L), jnp.float32)
    noise = jnp.concatenate(
        [jnp.pad(eps, ((0, 0), (0, Lp - L))),
         jnp.pad(eta, ((0, 0), (0, Lp - L)))], axis=1)      # (B, 2*Lp)

    TB = batch_tile if B >= batch_tile else max(8, -(-B // 8) * 8)
    Bp = -(-B // TB) * TB
    xp = jnp.pad(x.astype(jnp.float32), ((0, Bp - B), (0, Dp - D)))
    noise_p = jnp.pad(noise, ((0, Bp - B), (0, 0)))

    grid = (Bp // TB,)

    def batch_spec(width):
        return pl.BlockSpec((TB, width), lambda i: (i, 0))

    def const_spec(arr):
        return pl.BlockSpec(arr.shape, lambda i: (0, 0))     # VMEM-resident

    kernel = functools.partial(
        _vsc_fused_kernel,
        n_enc_extra=meta["n_enc_extra"], n_dec_extra=meta["n_dec_extra"],
        latent_pad=Lp, c=float(c),
        bias_offsets=meta["bias_offsets"], bias_widths=meta["bias_widths"],
    )

    mu, logvar, logspike, recon = pl.pallas_call(
        kernel,
        grid=grid,
        out_shape=(
            jax.ShapeDtypeStruct((Bp, Lp), jnp.float32),
            jax.ShapeDtypeStruct((Bp, Lp), jnp.float32),
            jax.ShapeDtypeStruct((Bp, Lp), jnp.float32),
            jax.ShapeDtypeStruct((Bp, Dp), jnp.float32),
        ),
        in_specs=[batch_spec(Dp), batch_spec(2 * Lp)]
                 + [const_spec(w) for w in weights]
                 + [const_spec(bias_all)],
        out_specs=(batch_spec(Lp), batch_spec(Lp), batch_spec(Lp), batch_spec(Dp)),
        compiler_params=pltpu.CompilerParams(
            dimension_semantics=("parallel",),
            vmem_limit_bytes=48 * 1024 * 1024,
        ),
    )(xp, noise_p, *weights, bias_all)

    return (recon[:B, :D], mu[:B, :L], logvar[:B, :L], logspike[:B, :L])


# ---------------------------- pure-JAX reference ------------------------------

def vsc_reference(params, x, noise_key, c=50.0, matmul_dtype=jnp.float32):
    """Straight-line VSC forward. With matmul_dtype=bf16 it reproduces the
    kernel's exact numerics (bf16 MXU inputs, f32 accumulation)."""
    def lin(p, h):
        w, b = p
        return jnp.dot(h.astype(matmul_dtype), w.astype(matmul_dtype),
                       preferred_element_type=jnp.float32) + b

    h1 = jax.nn.relu(lin(params["fc1"], x))
    for p in params["fc1n"]:
        h1 = jax.nn.relu(lin(p, h1))
    mu = lin(params["fc21"], h1)
    logvar = lin(params["fc22"], h1)
    logspike = -jax.nn.relu(-lin(params["fc23"], h1))

    k_eps, k_eta = jax.random.split(noise_key)
    eps = jax.random.normal(k_eps, mu.shape, jnp.float32)
    eta = jax.random.uniform(k_eta, mu.shape, jnp.float32)
    std = jnp.exp(0.5 * logvar)
    gaussian = eps * std + mu
    selection = jax.nn.sigmoid(c * (eta + jnp.exp(logspike) - 1.0))
    z = selection * gaussian

    h3 = jax.nn.relu(lin(params["fc3"], z))
    for p in params["fc3n"]:
        h3 = jax.nn.relu(lin(p, h3))
    recon = jax.nn.sigmoid(lin(params["fc4"], h3))
    return recon, mu, logvar, logspike


# ----------------------------------- main -------------------------------------

if __name__ == "__main__":
    input_sz = 32
    hidden_szs = [32, 16]
    latent_sz = 8
    batch = 8

    key = jax.random.PRNGKey(0)
    k_params, k_data, k_noise = jax.random.split(key, 3)

    params = init_vsc_params(k_params, input_sz, hidden_szs, latent_sz)
    packed = pack_vsc_params(params)
    x = jax.random.uniform(k_data, (batch, input_sz), jnp.float32)

    recon, mu, logvar, logspike = vsc_forward(packed, x, k_noise, c=50.0)
    jax.block_until_ready((recon, mu, logvar, logspike))

    assert recon.shape == (batch, input_sz)
    assert mu.shape == (batch, latent_sz)
    assert logvar.shape == (batch, latent_sz)
    assert logspike.shape == (batch, latent_sz)

    # Numerical check against a pure-JAX reference using the SAME bf16-matmul /
    # f32-accumulate numerics as the kernel (same noise key/stream).
    r_recon, r_mu, r_logvar, r_logspike = vsc_reference(
        params, x, k_noise, c=50.0, matmul_dtype=jnp.bfloat16)
    for got, want in zip((recon, mu, logvar, logspike),
                         (r_recon, r_mu, r_logvar, r_logspike)):
        assert jnp.allclose(got, want, atol=2e-3, rtol=2e-3), (
            float(jnp.max(jnp.abs(got - want))))

    assert bool(jnp.all(logspike <= 0.0))
    assert bool(jnp.all((recon >= 0.0) & (recon <= 1.0)))

    print("KERNEL_OK")
</pallas_src>

<mosaic_0001>
module attributes {stable_mosaic.version = 11 : i64} {
  func.func @_vsc_fused_kernel(%arg0: i32, %arg1: memref<8x128xf32, #tpu.memory_space<vmem>>, %arg2: memref<8x256xf32, #tpu.memory_space<vmem>>, %arg3: memref<128x128xbf16, #tpu.memory_space<vmem>>, %arg4: memref<128x128xbf16, #tpu.memory_space<vmem>>, %arg5: memref<128x384xbf16, #tpu.memory_space<vmem>>, %arg6: memref<128x128xbf16, #tpu.memory_space<vmem>>, %arg7: memref<128x128xbf16, #tpu.memory_space<vmem>>, %arg8: memref<128x128xbf16, #tpu.memory_space<vmem>>, %arg9: memref<1x1024xf32, #tpu.memory_space<vmem>>, %arg10: memref<8x128xf32, #tpu.memory_space<vmem>>, %arg11: memref<8x128xf32, #tpu.memory_space<vmem>>, %arg12: memref<8x128xf32, #tpu.memory_space<vmem>>, %arg13: memref<8x128xf32, #tpu.memory_space<vmem>>) attributes {dimension_semantics = [#tpu.dimension_semantics<parallel>], iteration_bounds = array<i64: 1>, scalar_prefetch = 0 : i64, scratch_operands = 0 : i64, tpu.core_type = #tpu.core_type<tc>, window_params = [{transform_indices = @transform_0, window_bounds = array<i64: 8, 128>}, {transform_indices = @transform_1, window_bounds = array<i64: 8, 256>}, {pipeline_mode = #tpu.pipeline_mode<synchronous>, transform_indices = @transform_2, window_bounds = array<i64: 128, 128>}, {pipeline_mode = #tpu.pipeline_mode<synchronous>, transform_indices = @transform_3, window_bounds = array<i64: 128, 128>}, {pipeline_mode = #tpu.pipeline_mode<synchronous>, transform_indices = @transform_4, window_bounds = array<i64: 128, 384>}, {pipeline_mode = #tpu.pipeline_mode<synchronous>, transform_indices = @transform_5, window_bounds = array<i64: 128, 128>}, {pipeline_mode = #tpu.pipeline_mode<synchronous>, transform_indices = @transform_6, window_bounds = array<i64: 128, 128>}, {pipeline_mode = #tpu.pipeline_mode<synchronous>, transform_indices = @transform_7, window_bounds = array<i64: 128, 128>}, {pipeline_mode = #tpu.pipeline_mode<synchronous>, transform_indices = @transform_8, window_bounds = array<i64: 1, 1024>}, {transform_indices = @transform_9, window_bounds = array<i64: 8, 128>}, {transform_indices = @transform_10, window_bounds = array<i64: 8, 128>}, {transform_indices = @transform_11, window_bounds = array<i64: 8, 128>}, {transform_indices = @transform_12, window_bounds = array<i64: 8, 128>}]} {
    %c0 = arith.constant 0 : index
    %c0_0 = arith.constant 0 : index
    %0 = vector.load %arg2[%c0, %c0_0] : memref<8x256xf32, #tpu.memory_space<vmem>>, vector<8x128xf32>
    %c0_1 = arith.constant 0 : index
    %c128 = arith.constant 128 : index
    %1 = vector.load %arg2[%c0_1, %c128] : memref<8x256xf32, #tpu.memory_space<vmem>>, vector<8x128xf32>
    %c0_2 = arith.constant 0 : index
    %c0_3 = arith.constant 0 : index
    %2 = vector.load %arg1[%c0_2, %c0_3] : memref<8x128xf32, #tpu.memory_space<vmem>>, vector<8x128xf32>
    %c0_4 = arith.constant 0 : index
    %c0_5 = arith.constant 0 : index
    %3 = vector.load %arg3[%c0_4, %c0_5] : memref<128x128xbf16, #tpu.memory_space<vmem>>, vector<128x128xbf16>
    %c0_6 = arith.constant 0 : index
    %c0_7 = arith.constant 0 : index
    %4 = vector.load %arg9[%c0_6, %c0_7] : memref<1x1024xf32, #tpu.memory_space<vmem>>, vector<1x128xf32>
    %5 = arith.truncf %2 : vector<8x128xf32> to vector<8x128xbf16>
    %cst = arith.constant dense<0.000000e+00> : vector<8x128xf32>
    %6 = tpu.matmul %5, %3, %cst {dimension_numbers = #tpu.dot_dimension_numbers<[1], [0], [0], [1], [0, 0, 1, 1], [], []>} : vector<8x128xbf16>, vector<128x128xbf16>, vector<8x128xf32> -> vector<8x128xf32>
    %7 = vector.broadcast %4 : vector<1x128xf32> to vector<8x128xf32>
    %8 = arith.addf %6, %7 : vector<8x128xf32>
    %cst_8 = arith.constant 0.000000e+00 : f32
    %9 = vector.broadcast %cst_8 : f32 to vector<8x128xf32>
    %10 = arith.maximumf %8, %9 : vector<8x128xf32>
    %c0_9 = arith.constant 0 : index
    %c0_10 = arith.constant 0 : index
    %11 = vector.load %arg4[%c0_9, %c0_10] : memref<128x128xbf16, #tpu.memory_space<vmem>>, vector<128x128xbf16>
    %c0_11 = arith.constant 0 : index
    %c128_12 = arith.constant 128 : index
    %12 = vector.load %arg9[%c0_11, %c128_12] : memref<1x1024xf32, #tpu.memory_space<vmem>>, vector<1x128xf32>
    %13 = arith.truncf %10 : vector<8x128xf32> to vector<8x128xbf16>
    %cst_13 = arith.constant dense<0.000000e+00> : vector<8x128xf32>
    %14 = tpu.matmul %13, %11, %cst_13 {dimension_numbers = #tpu.dot_dimension_numbers<[1], [0], [0], [1], [0, 0, 1, 1], [], []>} : vector<8x128xbf16>, vector<128x128xbf16>, vector<8x128xf32> -> vector<8x128xf32>
    %15 = vector.broadcast %12 : vector<1x128xf32> to vector<8x128xf32>
    %16 = arith.addf %14, %15 : vector<8x128xf32>
    %cst_14 = arith.constant 0.000000e+00 : f32
    %17 = vector.broadcast %cst_14 : f32 to vector<8x128xf32>
    %18 = arith.maximumf %16, %17 : vector<8x128xf32>
    %c0_15 = arith.constant 0 : index
    %c0_16 = arith.constant 0 : index
    %19 = vector.load %arg5[%c0_15, %c0_16] : memref<128x384xbf16, #tpu.memory_space<vmem>>, vector<128x384xbf16>
    %c0_17 = arith.constant 0 : index
    %c256 = arith.constant 256 : index
    %20 = vector.load %arg9[%c0_17, %c256] : memref<1x1024xf32, #tpu.memory_space<vmem>>, vector<1x384xf32>
    %21 = arith.truncf %18 : vector<8x128xf32> to vector<8x128xbf16>
    %cst_18 = arith.constant dense<0.000000e+00> : vector<8x384xf32>
    %22 = tpu.matmul %21, %19, %cst_18 {dimension_numbers = #tpu.dot_dimension_numbers<[1], [0], [0], [1], [0, 0, 1, 1], [], []>} : vector<8x128xbf16>, vector<128x384xbf16>, vector<8x384xf32> -> vector<8x384xf32>
    %23 = vector.broadcast %20 : vector<1x384xf32> to vector<8x384xf32>
    %24 = arith.addf %22, %23 : vector<8x384xf32>
    %25 = vector.extract_strided_slice %24 {offsets = [0, 0], sizes = [8, 128], strides = [1, 1]} : vector<8x384xf32> to vector<8x128xf32>
    %26 = vector.extract_strided_slice %24 {offsets = [0, 128], sizes = [8, 128], strides = [1, 1]} : vector<8x384xf32> to vector<8x128xf32>
    %27 = vector.extract_strided_slice %24 {offsets = [0, 256], sizes = [8, 128], strides = [1, 1]} : vector<8x384xf32> to vector<8x128xf32>
    %cst_19 = arith.constant 0.000000e+00 : f32
    %28 = vector.broadcast %cst_19 : f32 to vector<8x128xf32>
    %29 = arith.minimumf %27, %28 : vector<8x128xf32>
    %c0_20 = arith.constant 0 : index
    %c0_21 = arith.constant 0 : index
    %30 = vector.load %arg10[%c0_20, %c0_21] : memref<8x128xf32, #tpu.memory_space<vmem>>, vector<8x128xf32>
    tpu.vector_store %arg10[%c0_20, %c0_21], %25 {strides = array<i32>} : memref<8x128xf32, #tpu.memory_space<vmem>>, vector<8x128xf32>,
    %c0_22 = arith.constant 0 : index
    %c0_23 = arith.constant 0 : index
    %31 = vector.load %arg11[%c0_22, %c0_23] : memref<8x128xf32, #tpu.memory_space<vmem>>, vector<8x128xf32>
    tpu.vector_store %arg11[%c0_22, %c0_23], %26 {strides = array<i32>} : memref<8x128xf32, #tpu.memory_space<vmem>>, vector<8x128xf32>,
    %c0_24 = arith.constant 0 : index
    %c0_25 = arith.constant 0 : index
    %32 = vector.load %arg12[%c0_24, %c0_25] : memref<8x128xf32, #tpu.memory_space<vmem>>, vector<8x128xf32>
    tpu.vector_store %arg12[%c0_24, %c0_25], %29 {strides = array<i32>} : memref<8x128xf32, #tpu.memory_space<vmem>>, vector<8x128xf32>,
    %cst_26 = arith.constant 5.000000e-01 : f32
    %33 = vector.broadcast %cst_26 : f32 to vector<8x128xf32>
    %34 = arith.mulf %33, %26 : vector<8x128xf32>
    %35 = math.exp %34 : vector<8x128xf32>
    %36 = arith.mulf %0, %35 : vector<8x128xf32>
    %37 = arith.addf %36, %25 : vector<8x128xf32>
    %38 = math.exp %29 : vector<8x128xf32>
    %39 = arith.addf %1, %38 : vector<8x128xf32>
    %cst_27 = arith.constant 1.000000e+00 : f32
    %40 = vector.broadcast %cst_27 : f32 to vector<8x128xf32>
    %41 = arith.subf %39, %40 : vector<8x128xf32>
    %cst_28 = arith.constant 5.000000e+01 : f32
    %42 = vector.broadcast %cst_28 : f32 to vector<8x128xf32>
    %43 = arith.mulf %42, %41 : vector<8x128xf32>
    %44 = arith.negf %43 : vector<8x128xf32>
    %45 = math.exp %44 : vector<8x128xf32>
    %cst_29 = arith.constant 1.000000e+00 : f32
    %46 = vector.broadcast %cst_29 : f32 to vector<8x128xf32>
    %47 = arith.addf %46, %45 : vector<8x128xf32>
    %48 = arith.divf %46, %47 : vector<8x128xf32>
    %49 = arith.mulf %48, %37 : vector<8x128xf32>
    %c0_30 = arith.constant 0 : index
    %c0_31 = arith.constant 0 : index
    %50 = vector.load %arg6[%c0_30, %c0_31] : memref<128x128xbf16, #tpu.memory_space<vmem>>, vector<128x128xbf16>
    %c0_32 = arith.constant 0 : index
    %c640 = arith.constant 640 : index
    %51 = vector.load %arg9[%c0_32, %c640] : memref<1x1024xf32, #tpu.memory_space<vmem>>, vector<1x128xf32>
    %52 = arith.truncf %49 : vector<8x128xf32> to vector<8x128xbf16>
    %cst_33 = arith.constant dense<0.000000e+00> : vector<8x128xf32>
    %53 = tpu.matmul %52, %50, %cst_33 {dimension_numbers = #tpu.dot_dimension_numbers<[1], [0], [0], [1], [0, 0, 1, 1], [], []>} : vector<8x128xbf16>, vector<128x128xbf16>, vector<8x128xf32> -> vector<8x128xf32>
    %54 = vector.broadcast %51 : vector<1x128xf32> to vector<8x128xf32>
    %55 = arith.addf %53, %54 : vector<8x128xf32>
    %cst_34 = arith.constant 0.000000e+00 : f32
    %56 = vector.broadcast %cst_34 : f32 to vector<8x128xf32>
    %57 = arith.maximumf %55, %56 : vector<8x128xf32>
    %c0_35 = arith.constant 0 : index
    %c0_36 = arith.constant 0 : index
    %58 = vector.load %arg7[%c0_35, %c0_36] : memref<128x128xbf16, #tpu.memory_space<vmem>>, vector<128x128xbf16>
    %c0_37 = arith.constant 0 : index
    %c768 = arith.constant 768 : index
    %59 = vector.load %arg9[%c0_37, %c768] : memref<1x1024xf32, #tpu.memory_space<vmem>>, vector<1x128xf32>
    %60 = arith.truncf %57 : vector<8x128xf32> to vector<8x128xbf16>
    %cst_38 = arith.constant dense<0.000000e+00> : vector<8x128xf32>
    %61 = tpu.matmul %60, %58, %cst_38 {dimension_numbers = #tpu.dot_dimension_numbers<[1], [0], [0], [1], [0, 0, 1, 1], [], []>} : vector<8x128xbf16>, vector<128x128xbf16>, vector<8x128xf32> -> vector<8x128xf32>
    %62 = vector.broadcast %59 : vector<1x128xf32> to vector<8x128xf32>
    %63 = arith.addf %61, %62 : vector<8x128xf32>
    %cst_39 = arith.constant 0.000000e+00 : f32
    %64 = vector.broadcast %cst_39 : f32 to vector<8x128xf32>
    %65 = arith.maximumf %63, %64 : vector<8x128xf32>
    %c0_40 = arith.constant 0 : index
    %c0_41 = arith.constant 0 : index
    %66 = vector.load %arg8[%c0_40, %c0_41] : memref<128x128xbf16, #tpu.memory_space<vmem>>, vector<128x128xbf16>
    %c0_42 = arith.constant 0 : index
    %c896 = arith.constant 896 : index
    %67 = vector.load %arg9[%c0_42, %c896] : memref<1x1024xf32, #tpu.memory_space<vmem>>, vector<1x128xf32>
    %68 = arith.truncf %65 : vector<8x128xf32> to vector<8x128xbf16>
    %cst_43 = arith.constant dense<0.000000e+00> : vector<8x128xf32>
    %69 = tpu.matmul %68, %66, %cst_43 {dimension_numbers = #tpu.dot_dimension_numbers<[1], [0], [0], [1], [0, 0, 1, 1], [], []>} : vector<8x128xbf16>, vector<128x128xbf16>, vector<8x128xf32> -> vector<8x128xf32>
    %70 = vector.broadcast %67 : vector<1x128xf32> to vector<8x128xf32>
    %71 = arith.addf %69, %70 : vector<8x128xf32>
    %72 = arith.negf %71 : vector<8x128xf32>
    %73 = math.exp %72 : vector<8x128xf32>
    %cst_44 = arith.constant 1.000000e+00 : f32
    %74 = vector.broadcast %cst_44 : f32 to vector<8x128xf32>
    %75 = arith.addf %74, %73 : vector<8x128xf32>
    %76 = arith.divf %74, %75 : vector<8x128xf32>
    %c0_45 = arith.constant 0 : index
    %c0_46 = arith.constant 0 : index
    %77 = vector.load %arg13[%c0_45, %c0_46] : memref<8x128xf32, #tpu.memory_space<vmem>>, vector<8x128xf32>
    tpu.vector_store %arg13[%c0_45, %c0_46], %76 {strides = array<i32>} : memref<8x128xf32, #tpu.memory_space<vmem>>, vector<8x128xf32>,
    return
  }
  func.func @transform_0(%arg0: i32) -> (i32, i32) {
    %c0_i32 = arith.constant 0 : i32
    %c0_i32_0 = arith.constant 0 : i32
    return %arg0, %c0_i32 : i32, i32
  }
  func.func @transform_1(%arg0: i32) -> (i32, i32) {
    %c0_i32 = arith.constant 0 : i32
    %c0_i32_0 = arith.constant 0 : i32
    return %arg0, %c0_i32 : i32, i32
  }
  func.func @transform_2(%arg0: i32) -> (i32, i32) {
    %c0_i32 = arith.constant 0 : i32
    %c0_i32_0 = arith.constant 0 : i32
    %c0_i32_1 = arith.constant 0 : i32
    return %c0_i32, %c0_i32_0 : i32, i32
  }
  func.func @transform_3(%arg0: i32) -> (i32, i32) {
    %c0_i32 = arith.constant 0 : i32
    %c0_i32_0 = arith.constant 0 : i32
    %c0_i32_1 = arith.constant 0 : i32
    return %c0_i32, %c0_i32_0 : i32, i32
  }
  func.func @transform_4(%arg0: i32) -> (i32, i32) {
    %c0_i32 = arith.constant 0 : i32
    %c0_i32_0 = arith.constant 0 : i32
    %c0_i32_1 = arith.constant 0 : i32
    return %c0_i32, %c0_i32_0 : i32, i32
  }
  func.func @transform_5(%arg0: i32) -> (i32, i32) {
    %c0_i32 = arith.constant 0 : i32
    %c0_i32_0 = arith.constant 0 : i32
    %c0_i32_1 = arith.constant 0 : i32
    return %c0_i32, %c0_i32_0 : i32, i32
  }
  func.func @transform_6(%arg0: i32) -> (i32, i32) {
    %c0_i32 = arith.constant 0 : i32
    %c0_i32_0 = arith.constant 0 : i32
    %c0_i32_1 = arith.constant 0 : i32
    return %c0_i32, %c0_i32_0 : i32, i32
  }
  func.func @transform_7(%arg0: i32) -> (i32, i32) {
    %c0_i32 = arith.constant 0 : i32
    %c0_i32_0 = arith.constant 0 : i32
    %c0_i32_1 = arith.constant 0 : i32
    return %c0_i32, %c0_i32_0 : i32, i32
  }
  func.func @transform_8(%arg0: i32) -> (i32, i32) {
    %c0_i32 = arith.constant 0 : i32
    %c0_i32_0 = arith.constant 0 : i32
    %c0_i32_1 = arith.constant 0 : i32
    return %c0_i32, %c0_i32_0 : i32, i32
  }
  func.func @transform_9(%arg0: i32) -> (i32, i32) {
    %c0_i32 = arith.constant 0 : i32
    %c0_i32_0 = arith.constant 0 : i32
    return %arg0, %c0_i32 : i32, i32
  }
  func.func @transform_10(%arg0: i32) -> (i32, i32) {
    %c0_i32 = arith.constant 0 : i32
    %c0_i32_0 = arith.constant 0 : i32
    return %arg0, %c0_i32 : i32, i32
  }
  func.func @transform_11(%arg0: i32) -> (i32, i32) {
    %c0_i32 = arith.constant 0 : i32
    %c0_i32_0 = arith.constant 0 : i32
    return %arg0, %c0_i32 : i32, i32
  }
  func.func @transform_12(%arg0: i32) -> (i32, i32) {
    %c0_i32 = arith.constant 0 : i32
    %c0_i32_0 = arith.constant 0 : i32
    return %arg0, %c0_i32 : i32, i32
  }
}

</mosaic_0001>

<bundles_post_ra>
// kernel: tpu_custom_call.1
= control target key start
LH: loop header
LB: loop body
LE: loop exit
PB: predicated region body
PF: predicated region fallthrough
CT: control target
= control target key end

     0   :  { %18 = vsyncpa [#allocation3], 0  ;;  %s2016_s0 = inlined_call_operand.hbm [shape: f32[8,128], index: 0, kind: input, shape index: {}]   ;;  %s2017_s1 = inlined_call_operand.hbm [shape: f32[8,256], index: 1, kind: input, shape index: {}]   ;;  %s2018_s2 = inlined_call_operand.hbm [shape: bf16[128,128], index: 2, kind: input, shape index: {}]   ;;  %s2019_s3 = inlined_call_operand.hbm [shape: bf16[128,128], index: 3, kind: input, shape index: {}]   ;;  %s2020_s4 = inlined_call_operand.hbm [shape: bf16[128,384], index: 4, kind: input, shape index: {}]   ;;  %s2021_s5 = inlined_call_operand.hbm [shape: bf16[128,128], index: 5, kind: input, shape index: {}]   ;;  %s2022_s6 = inlined_call_operand.hbm [shape: bf16[128,128], index: 6, kind: input, shape index: {}]   ;;  %s2023_s7 = inlined_call_operand.hbm [shape: bf16[128,128], index: 7, kind: input, shape index: {}]   ;;  %s2024_s8 = inlined_call_operand.vmem [shape: f32[1,1024], index: 8, kind: input, shape index: {}]   ;;  %s2025_s9 = inlined_call_operand.hbm [shape: f32[8,128], index: 9, kind: output, shape index: {0}]   ;;  %s2026_s10 = inlined_call_operand.hbm [shape: f32[8,128], index: 10, kind: output, shape index: {1}]   ;;  %s2027_s11 = inlined_call_operand.hbm [shape: f32[8,128], index: 11, kind: output, shape index: {2}]   ;;  %s2028_s12 = inlined_call_operand.hbm [shape: f32[8,128], index: 12, kind: output, shape index: {3}]  }
   0x1   :  { %19 = vsyncpa [#allocation6], 0 }
   0x2   :  { %20 = vsyncpa [#allocation9], 0 }
   0x3   :  { %21 = vsyncpa [#allocation12], 0 }
   0x4   :  { %22 = vsyncpa [#allocation15], 0 }
   0x5   :  { %23 = vsyncpa [#allocation4], 0 }
   0x6   :  { %24 = vsyncpa [#allocation18], 0 }
   0x7   :  { %25 = vsyncpa [#allocation21], 0  ;;  %s1688_s21 = smov [#allocation5]   ;;  %s1408_s25 = scalar_lea.hbm %s2017_s1, 256 }
   0x8   :  { %s42_s22 = sshll.u32 %s1688_s21, 4  ;;  %p1409_p0 = scmp.ne.s32.totalorder %s2017_s1, %s1408_s25  ;;  %s43_s22 = int_to_ptr.vmem [resolvable:$true] %s42_s22 }
   0x9   :  { %p1412_p1 = scmp.lt.u32.totalorder %s1408_s25, %s2017_s1 }
   0xb   :  { %p1414_p2 = pnand %p1412_p1, %p1409_p0 }
   0xd   :  { %1417 = shalt.err (!%p1414_p2)
}
   0xe   :  { %s1418_s30 = scalar_lea.vmem %s43_s22, 256  ;;  %p1423_p4 = scmp.lt.s32.totalorder %s43_s22, %s43_s22 }
   0xf   :  { %p1419_p3 = scmp.ne.s32.totalorder %s43_s22, %s1418_s30  ;;  %p1424_p5 = scmp.lt.s32.totalorder %s1418_s30, %s1418_s30 }
  0x11   :  { %p1425_p6 = por %p1424_p5, %p1423_p4 }
  0x13   :  { %p1426_p7 = pnand %p1425_p6, %p1419_p3 }
  0x15   :  { %1429 = shalt.err (!%p1426_p7)
}
  0x16   :  { %45 = dma.hbm_to_vmem [thread:$0]  %s2017_s1, 256, %s43_s22, [#allocation6]  }
  0x17   :  { %s1689_s15 = smov [#allocation8]   ;;  %s1690_s17 = smov [#allocation11]  }
  0x18   :  { %s63_s16 = sshll.u32 %s1689_s15, 4  ;;  %s87_s18 = sshll.u32 %s1690_s17, 4  ;;  %s64_s16 = int_to_ptr.vmem [resolvable:$true] %s63_s16  ;;  %s88_s18 = int_to_ptr.vmem [resolvable:$true] %s87_s18 }
  0x19   :  { %s1430_s21 = scalar_lea.hbm %s2019_s3, 1024 }
  0x1a   :  { %p1431_p8 = scmp.ne.s32.totalorder %s2019_s3, %s1430_s21  ;;  %p1434_p9 = scmp.lt.u32.totalorder %s1430_s21, %s2019_s3 }
  0x1c   :  { %p1436_p10 = pnand %p1434_p9, %p1431_p8 }
  0x1e   :  { %1439 = shalt.err (!%p1436_p10)
}
  0x1f   :  { %s1440_s1 = scalar_lea.vmem %s64_s16, 1024  ;;  %p1445_p12 = scmp.lt.s32.totalorder %s64_s16, %s64_s16 }
  0x20   :  { %p1441_p11 = scmp.ne.s32.totalorder %s64_s16, %s1440_s1  ;;  %p1446_p13 = scmp.lt.s32.totalorder %s1440_s1, %s1440_s1 }
  0x22   :  { %p1447_p0 = por %p1446_p13, %p1445_p12 }
  0x24   :  { %p1448_p1 = pnand %p1447_p0, %p1441_p11 }
  0x26   :  { %1451 = shalt.err (!%p1448_p1)
}
  0x27   :  { %s1691_s22 = smov 64   ;;  %s1692_s27 = smov 4  }
  0x28   :  { %69 = dma.hbm_to_vmem [thread:$0]  %s2019_s3, 1024, %s64_s16, [#allocation9], %s1691_s22, %s1691_s22, %s1692_s27  }
  0x29   :  { %s1452_s14 = scalar_lea.hbm %s2021_s5, 1024 }
  0x2a   :  { %p1453_p2 = scmp.ne.s32.totalorder %s2021_s5, %s1452_s14  ;;  %p1456_p3 = scmp.lt.u32.totalorder %s1452_s14, %s2021_s5 }
  0x2c   :  { %p1458_p4 = pnand %p1456_p3, %p1453_p2 }
  0x2e   :  { %1461 = shalt.err (!%p1458_p4)
}
  0x2f   :  { %s1462_s21 = scalar_lea.vmem %s88_s18, 1024  ;;  %p1467_p6 = scmp.lt.s32.totalorder %s88_s18, %s88_s18 }
  0x30   :  { %p1463_p5 = scmp.ne.s32.totalorder %s88_s18, %s1462_s21  ;;  %p1468_p7 = scmp.lt.s32.totalorder %s1462_s21, %s1462_s21 }
  0x32   :  { %p1469_p8 = por %p1468_p7, %p1467_p6 }
  0x34   :  { %p1470_p9 = pnand %p1469_p8, %p1463_p5 }
  0x36   :  { %1473 = shalt.err (!%p1470_p9)
}
  0x37   :  { %93 = dma.hbm_to_vmem [thread:$0]  %s2021_s5, 1024, %s88_s18, [#allocation12], %s1691_s22, %s1691_s22, %s1692_s27  }
  0x38   :  { %s1693_s23 = smov [#allocation2]   ;;  %s1694_s25 = smov [#allocation7]  }
  0x39   :  { %s32_s24 = sshll.u32 %s1693_s23, 4  ;;  %s51_s26 = sshll.u32 %s1694_s25, 4  ;;  %s33_s24 = int_to_ptr.vmem [resolvable:$true] %s32_s24  ;;  %s52_s26 = int_to_ptr.vmem [resolvable:$true] %s51_s26 }
  0x3a   :  { %s1474_s29 = scalar_lea.hbm %s2016_s0, 128 }
  0x3b   :  { %p1475_p10 = scmp.ne.s32.totalorder %s2016_s0, %s1474_s29  ;;  %p1478_p11 = scmp.lt.u32.totalorder %s1474_s29, %s2016_s0 }
  0x3d   :  { %p1480_p12 = pnand %p1478_p11, %p1475_p10 }
  0x3f   :  { %1483 = shalt.err (!%p1480_p12)
}
  0x40   :  { %s1484_s5 = scalar_lea.vmem %s33_s24, 128  ;;  %p1489_p0 = scmp.lt.s32.totalorder %s33_s24, %s33_s24 }
  0x41   :  { %p1485_p13 = scmp.ne.s32.totalorder %s33_s24, %s1484_s5  ;;  %p1490_p1 = scmp.lt.s32.totalorder %s1484_s5, %s1484_s5 }
  0x43   :  { %p1491_p2 = por %p1490_p1, %p1489_p0 }
  0x45   :  { %p1492_p3 = pnand %p1491_p2, %p1485_p13 }
  0x47   :  { %1495 = shalt.err (!%p1492_p3)
}
  0x48   :  { %35 = dma.hbm_to_vmem [thread:$0]  %s2016_s0, 128, %s33_s24, [#allocation3]  }
  0x49   :  { %s1496_s21 = scalar_lea.hbm %s2018_s2, 1024 }
  0x4a   :  { %p1497_p4 = scmp.ne.s32.totalorder %s2018_s2, %s1496_s21  ;;  %p1500_p5 = scmp.lt.u32.totalorder %s1496_s21, %s2018_s2 }
  0x4c   :  { %p1502_p6 = pnand %p1500_p5, %p1497_p4 }
  0x4e   :  { %1505 = shalt.err (!%p1502_p6)
}
  0x4f   :  { %s1506_s1 = scalar_lea.vmem %s52_s26, 1024  ;;  %p1511_p8 = scmp.lt.s32.totalorder %s52_s26, %s52_s26 }
  0x50   :  { %p1507_p7 = scmp.ne.s32.totalorder %s52_s26, %s1506_s1  ;;  %p1512_p9 = scmp.lt.s32.totalorder %s1506_s1, %s1506_s1 }
  0x52   :  { %p1513_p10 = por %p1512_p9, %p1511_p8 }
  0x54   :  { %p1514_p11 = pnand %p1513_p10, %p1507_p7 }
  0x56   :  { %1517 = shalt.err (!%p1514_p11)
}
  0x57   :  { %57 = dma.hbm_to_vmem [thread:$0]  %s2018_s2, 1024, %s52_s26, [#allocation6], %s1691_s22, %s1691_s22, %s1692_s27  }
  0x58   :  { %s1695_s28 = smov [#allocation10]   ;;  %s1518_s14 = scalar_lea.hbm %s2020_s4, 3072 }
  0x59   :  { %s75_s29 = sshll.u32 %s1695_s28, 4  ;;  %p1519_p12 = scmp.ne.s32.totalorder %s2020_s4, %s1518_s14  ;;  %s76_s29 = int_to_ptr.vmem [resolvable:$true] %s75_s29 }
  0x5a   :  { %p1522_p13 = scmp.lt.u32.totalorder %s1518_s14, %s2020_s4 }
  0x5c   :  { %p1524_p0 = pnand %p1522_p13, %p1519_p12 }
  0x5e   :  { %1527 = shalt.err (!%p1524_p0)
}
  0x5f   :  { %s1528_s19 = scalar_lea.vmem %s76_s29, 3072  ;;  %p1533_p2 = scmp.lt.s32.totalorder %s76_s29, %s76_s29 }
  0x60   :  { %p1529_p1 = scmp.ne.s32.totalorder %s76_s29, %s1528_s19  ;;  %p1534_p3 = scmp.lt.s32.totalorder %s1528_s19, %s1528_s19 }
  0x62   :  { %p1535_p4 = por %p1534_p3, %p1533_p2 }
  0x64   :  { %p1536_p5 = pnand %p1535_p4, %p1529_p1 }
  0x66   :  { %1539 = shalt.err (!%p1536_p5)
}
  0x67   :  { %s1696_s2 = smov 192   ;;  %s1697_s26 = smov 12  }
  0x68   :  { %81 = dma.hbm_to_vmem [thread:$0]  %s2020_s4, 3072, %s76_s29, [#allocation9], %s1696_s2, %s1696_s2, %s1697_s26  }
  0x69   :  { %s1698_s3 = smov [#allocation13]   ;;  %s1699_s23 = smov [#allocation14]  }
  0x6a   :  { %s99_s16 = sshll.u32 %s1698_s3, 4  ;;  %s111_s25 = sshll.u32 %s1699_s23, 4  ;;  %s100_s16 = int_to_ptr.vmem [resolvable:$true] %s99_s16  ;;  %s1853_s25 = int_to_ptr.vmem [resolvable:$true] %s111_s25 }
  0x6b   :  { %s1540_s24 = scalar_lea.hbm %s2022_s6, 1024 }
  0x6c   :  { %p1541_p6 = scmp.ne.s32.totalorder %s2022_s6, %s1540_s24  ;;  %p1544_p7 = scmp.lt.u32.totalorder %s1540_s24, %s2022_s6 }
  0x6e   :  { %p1546_p8 = pnand %p1544_p7, %p1541_p6 }
  0x70   :  { %1549 = shalt.err (!%p1546_p8)
}
  0x71   :  { %s1550_s4 = scalar_lea.vmem %s100_s16, 1024  ;;  %p1555_p10 = scmp.lt.s32.totalorder %s100_s16, %s100_s16 }
  0x72   :  { %p1551_p9 = scmp.ne.s32.totalorder %s100_s16, %s1550_s4  ;;  %p1556_p11 = scmp.lt.s32.totalorder %s1550_s4, %s1550_s4 }
  0x74   :  { %p1557_p12 = por %p1556_p11, %p1555_p10 }
  0x76   :  { %p1558_p13 = pnand %p1557_p12, %p1551_p9 }
  0x78   :  { %1561 = shalt.err (!%p1558_p13)
}
  0x79   :  { %105 = dma.hbm_to_vmem [thread:$0]  %s2022_s6, 1024, %s100_s16, [#allocation12], %s1691_s22, %s1691_s22, %s1692_s27  }
  0x7a   :  { %s1562_s17 = scalar_lea.hbm %s2023_s7, 1024 }
  0x7b   :  { %p1563_p0 = scmp.ne.s32.totalorder %s2023_s7, %s1562_s17  ;;  %p1566_p1 = scmp.lt.u32.totalorder %s1562_s17, %s2023_s7 }
  0x7d   :  { %p1568_p2 = pnand %p1566_p1, %p1563_p0 }
  0x7f   :  { %1571 = shalt.err (!%p1568_p2)
}
  0x80   :  { %s1572_s21 = scalar_lea.vmem %s1853_s25, 1024  ;;  %p1577_p4 = scmp.lt.s32.totalorder %s1853_s25, %s1853_s25 }
  0x81   :  { %p1573_p3 = scmp.ne.s32.totalorder %s1853_s25, %s1572_s21  ;;  %p1578_p5 = scmp.lt.s32.totalorder %s1572_s21, %s1572_s21 }
  0x83   :  { %p1579_p6 = por %p1578_p5, %p1577_p4 }
  0x85   :  { %p1580_p7 = pnand %p1579_p6, %p1573_p3 }
  0x87   :  { %1583 = shalt.err (!%p1580_p7)
}
  0x88   :  { %117 = dma.hbm_to_vmem [thread:$0]  %s2023_s7, 1024, %s1853_s25, [#allocation15], %s1691_s22, %s1691_s22, %s1692_s27  }
  0x89   :  { %1672 = dma.done.wait [#allocation3], 128  }
  0x8a   :  { %1673 = vsyncadd [#allocation3], 4294967168 }
  0x8b   :  { %1674 = dma.done.wait [#allocation6], 1280  }
  0x8c   :  { %1675 = vsyncadd [#allocation6], 4294966016 }
  0x8d   :  { %1676 = dma.done.wait [#allocation9], 4096  }
  0x8e   :  { %1677 = vsyncadd [#allocation9], 4294963200 }
  0x8f   :  { %1678 = dma.done.wait [#allocation12], 2048  }
  0x90   :  { %1679 = vsyncadd [#allocation12], 4294965248 }
  0x91   :  { %1680 = dma.done.wait [#allocation15], 1024  }
  0x92   :  { %1681 = vsyncadd [#allocation15], 4294966272  ;;  %v1700_v0 = vmov 0.0   ;;  %vm1701_vm0 = vmmov 0   ;;  %v1324_v1 = vld [vmem:[#allocation7] sm:$0xff]   ;;  %v1325_v2 = vld [vmem:[#allocation7 + $0x8] sm:$0xff]  }
  0x93   :  { %1185 = vmatprep.subr.bf16.mxu0 %v1700_v0  ;;  %1201 = vmatprep.mubr.msk.bf16.mxu0 %vm1701_vm0, %v1700_v0  ;;  %v1326_v3 = vld [vmem:[#allocation7 + $0x10] sm:$0xff]   ;;  %v1332_v4 = vld [vmem:[#allocation8] sm:$0xff]   ;;  %v1327_v5 = vld [vmem:[#allocation7 + $0x18] sm:$0xff]   ;;  %v1702_v51 = vmov 0   ;;  %s1703_s30 = smov [#allocation17]   ;;  %s1704_s14 = smov [#allocation16]  }
  0x94   :  { %1205 = vmatprep.subr.bf16.mxu1 %v1700_v0  ;;  %1221 = vmatprep.mubr.msk.bf16.mxu1 %vm1701_vm0, %v1700_v0  ;;  %v1333_v6 = vld [vmem:[#allocation8 + $0x8] sm:$0xff]   ;;  %v1328_v7 = vld [vmem:[#allocation7 + $0x20] sm:$0xff]   ;;  %v1334_v8 = vld [vmem:[#allocation8 + $0x10] sm:$0xff]   ;;  %s1015_s13 = sshll.u32 %s1703_s30, 4  ;;  %s1005_s4 = sshll.u32 %s1704_s14, 4  ;;  %s1016_s13 = int_to_ptr.vmem [resolvable:$true] %s1015_s13  ;;  %s1006_s4 = int_to_ptr.vmem [resolvable:$true] %s1005_s4 }
  0x95   :  { %1186 = vmatpush3.bf16.msra.mxu0 %v1324_v1  ;;  %1206 = vmatpush3.bf16.msra.mxu1 %v1332_v4  ;;  %v1329_v9 = vld [vmem:[#allocation7 + $0x28] sm:$0xff]   ;;  %v1335_v10 = vld [vmem:[#allocation8 + $0x18] sm:$0xff]   ;;  %v1330_v11 = vld [vmem:[#allocation7 + $0x30] sm:$0xff]   ;;  %s1584_s29 = scalar_lea.vmem %s1016_s13, 128  ;;  %p1589_p9 = scmp.lt.s32.totalorder %s1016_s13, %s1016_s13 }
  0x96   :  { %1187 = vmatprep.subr.bf16.mxu0 %v1700_v0  ;;  %1207 = vmatprep.subr.bf16.mxu1 %v1700_v0  ;;  %v1336_v12 = vld [vmem:[#allocation8 + $0x20] sm:$0xff]   ;;  %v1331_v13 = vld [vmem:[#allocation7 + $0x38] sm:$0xff]   ;;  %v147_v14 = vld [vmem:[#allocation2] sm:$0xff]  ;;  %p1585_p8 = scmp.ne.s32.totalorder %s1016_s13, %s1584_s29  ;;  %p1590_p10 = scmp.lt.s32.totalorder %s1584_s29, %s1584_s29 }
  0x97   :  { %v1337_v15 = vld [vmem:[#allocation8 + $0x28] sm:$0xff]   ;;  %v165_v16 = vpack.c.bf16 %v147_v14, %v147_v14  ;;  %v1338_v17 = vld [vmem:[#allocation8 + $0x30] sm:$0xff]   ;;  %v1339_v18 = vld [vmem:[#allocation8 + $0x38] sm:$0xff]  }
  0x98   :  { %v1340_v19 = vld [vmem:[#allocation10] ss:$12 sps:$4 sm:$0xff]   ;;  %v1342_v20 = vld [vmem:[#allocation10 + $0x4] ss:$12 sps:$4 sm:$0xff]   ;;  %v1346_v21 = vld [vmem:[#allocation10 + $0x1c] ss:$12 sps:$4 sm:$0xff]   ;;  %p1591_p11 = por %p1590_p10, %p1589_p9 }
  0x99   :  { %1188 = vmatpush3.bf16.msra.mxu0 %v1325_v2  ;;  %1208 = vmatpush3.bf16.msra.mxu1 %v1333_v6  ;;  %v1344_v22 = vld [vmem:[#allocation10 + $0x18] ss:$12 sps:$4 sm:$0xff]   ;;  %v1350_v23 = vld [vmem:[#allocation10 + $0x34] ss:$12 sps:$4 sm:$0xff]   ;;  %v1348_v24 = vld [vmem:[#allocation10 + $0x30] ss:$12 sps:$4 sm:$0xff]  }
  0x9a   :  { %1189 = vmatprep.subr.bf16.mxu0 %v1700_v0  ;;  %1209 = vmatprep.subr.bf16.mxu1 %v1700_v0  ;;  %v1354_v25 = vld [vmem:[#allocation10 + $0x4c] ss:$12 sps:$4 sm:$0xff]   ;;  %v1352_v26 = vld [vmem:[#allocation10 + $0x48] ss:$12 sps:$4 sm:$0xff]   ;;  %v1358_v27 = vld [vmem:[#allocation10 + $0x64] ss:$12 sps:$4 sm:$0xff]   ;;  %p1592_p12 = pnand %p1591_p11, %p1585_p8 }
  0x9b   :  { %v1356_v28 = vld [vmem:[#allocation10 + $0x60] ss:$12 sps:$4 sm:$0xff]   ;;  %v1362_v29 = vld [vmem:[#allocation10 + $0x7c] ss:$12 sps:$4 sm:$0xff]   ;;  %v1360_v30 = vld [vmem:[#allocation10 + $0x78] ss:$12 sps:$4 sm:$0xff]  }
  0x9c   :  { %v1366_v31 = vld [vmem:[#allocation10 + $0x94] ss:$12 sps:$4 sm:$0xff]   ;;  %v1364_v32 = vld [vmem:[#allocation10 + $0x90] ss:$12 sps:$4 sm:$0xff]   ;;  %v1059_v33 = vld [vmem:[%s2024_s8] ss:$0 sm:$0xff] }
  0x9d   :  { %1190 = vmatpush3.bf16.msra.mxu0 %v1326_v3  ;;  %1210 = vmatpush3.bf16.msra.mxu1 %v1334_v8  ;;  %v1343_v40 = vld [vmem:[#allocation10 + $0x8] ss:$12 sps:$4 sm:$0xff]   ;;  %v1347_v42 = vld [vmem:[#allocation10 + $0x20] ss:$12 sps:$4 sm:$0xff]   ;;  %v1351_v43 = vld [vmem:[#allocation10 + $0x38] ss:$12 sps:$4 sm:$0xff]  }
  0x9e   :  { %1191 = vmatprep.subr.bf16.mxu0 %v1700_v0  ;;  %1211 = vmatprep.subr.bf16.mxu1 %v1700_v0  ;;  %v1355_v44 = vld [vmem:[#allocation10 + $0x50] ss:$12 sps:$4 sm:$0xff]   ;;  %v1359_v45 = vld [vmem:[#allocation10 + $0x68] ss:$12 sps:$4 sm:$0xff]   ;;  %v1363_v46 = vld [vmem:[#allocation10 + $0x80] ss:$12 sps:$4 sm:$0xff]  }
  0x9f   :  { %v1367_v47 = vld [vmem:[#allocation10 + $0x98] ss:$12 sps:$4 sm:$0xff]   ;;  %v1368_v49 = vld [vmem:[#allocation10 + $0xa8] ss:$12 sps:$4 sm:$0xff]   ;;  %v1371_v50 = vld [vmem:[#allocation10 + $0xb0] ss:$12 sps:$4 sm:$0xff]  }
  0xa0   :  { %v1370_v48 = vld [vmem:[#allocation10 + $0xac] ss:$12 sps:$4 sm:$0xff]   ;;  %v1068_v52 = vld [vmem:[%s2024_s8 + $0x1] ss:$0 sm:$0xff]  ;;  %v1372_v60 = vld [vmem:[#allocation11] sm:$0xff]  }
  0xa1   :  { %1192 = vmatpush3.bf16.msra.mxu0 %v1327_v5  ;;  %1212 = vmatpush3.bf16.msra.mxu1 %v1335_v10  ;;  %v1373_v61 = vld [vmem:[#allocation11 + $0x8] sm:$0xff]   ;;  %v1374_v62 = vld [vmem:[#allocation11 + $0x10] sm:$0xff]   ;;  %v1375_v63 = vld [vmem:[#allocation11 + $0x18] sm:$0xff]  }
  0xa2   :  { %1193 = vmatprep.subr.bf16.mxu0 %v1700_v0  ;;  %1213 = vmatprep.subr.bf16.mxu1 %v1700_v0  ;;  %v1376_v1 = vld [vmem:[#allocation11 + $0x20] sm:$0xff]   ;;  %v1377_v2 = vld [vmem:[#allocation11 + $0x28] sm:$0xff]   ;;  %v1378_v3 = vld [vmem:[#allocation11 + $0x30] sm:$0xff]  }
  0xa3   :  { %v1379_v4 = vld [vmem:[#allocation11 + $0x38] sm:$0xff]   ;;  %v1380_v5 = vld [vmem:[#allocation13] sm:$0xff]   ;;  %v1381_v6 = vld [vmem:[#allocation13 + $0x8] sm:$0xff]  }
  0xa4   :  { %v1383_v8 = vld [vmem:[#allocation13 + $0x18] sm:$0xff]   ;;  %v1385_v10 = vld [vmem:[#allocation13 + $0x28] sm:$0xff]  }
  0xa5   :  { %1194 = vmatpush3.bf16.msra.mxu0 %v1328_v7  ;;  %1214 = vmatpush3.bf16.msra.mxu1 %v1336_v12  ;;  %v1382_v7 = vld [vmem:[#allocation13 + $0x10] sm:$0xff]  }
  0xa6   :  { %1195 = vmatprep.subr.bf16.mxu0 %v1700_v0  ;;  %1215 = vmatprep.subr.bf16.mxu1 %v1700_v0 }
  0xa9   :  { %1196 = vmatpush3.bf16.msra.mxu0 %v1329_v9  ;;  %1216 = vmatpush3.bf16.msra.mxu1 %v1337_v15  ;;  %v1384_v9 = vld [vmem:[#allocation13 + $0x20] sm:$0xff]   ;;  %v406_v15 = vld [vmem:[%s2024_s8 + $0x2] sm:$0x7] }
  0xaa   :  { %1197 = vmatprep.subr.bf16.mxu0 %v1700_v0  ;;  %1217 = vmatprep.subr.bf16.mxu1 %v1700_v0 }
  0xad   :  { %1198 = vmatpush3.bf16.msra.mxu0 %v1330_v11  ;;  %1218 = vmatpush3.bf16.msra.mxu1 %v1338_v17  ;;  %v409_v11 = vlaneseq }
  0xae   :  { %1199 = vmatprep.subr.bf16.mxu0 %v1700_v0  ;;  %1219 = vmatprep.subr.bf16.mxu1 %v1700_v0 }
  0xaf   :  { %v410_v12 = vshrl.u32 %v409_v11, 7 }
  0xb1   :  { %1200 = vmatpush3.bf16.msra.mxu0 %v1331_v13  ;;  %1220 = vmatpush3.bf16.msra.mxu1 %v1339_v18  ;;  %v411_v13 = vsub.s32 0, %v410_v12  ;;  %v419_v14 = vsub.s32 2, %v410_v12 }
  0xb2   :  { %1225 = vmatprep.subr.bf16.mxu1 %v1700_v0  ;;  %552 = vmatprep.subr.bf16.mxu0 %v1342_v20 }
  0xb3   :  { %v412_v17 = vrot.slane %v406_v15, %v411_v13  ;;  %v420_v18 = vrot.slane %v406_v15, %v419_v14 }
  0xb4   :  { %1202 = vmatmul.mubr.bf16.vlgmr.msra.gmra.mrb[0].mxu0 %v165_v16  ;;  %v415_v16 = vsub.s32 1, %v410_v12 }
  0xb5   :  { %553 = vmatpush1.bf16.msra.mxu0 %v1340_v19  ;;  %584 = vmatprep.mubr.bf16.mxu0 %v1702_v51  ;;  %v1387_v51 = vld [vmem:[#allocation13 + $0x38] sm:$0xff]  }
  0xb6   :  { %554 = vmatprep.subr.bf16.mxu0 %v1346_v21  ;;  %v416_v19 = vrot.slane %v406_v15, %v415_v16 }
  0xb9   :  { %555 = vmatpush1.bf16.msra.mxu0 %v1344_v22 }
  0xba   :  { %556 = vmatprep.subr.bf16.mxu0 %v1350_v23 }
  0xbd   :  { %557 = vmatpush1.bf16.msra.mxu0 %v1348_v24 }
  0xbe   :  { %558 = vmatprep.subr.bf16.mxu0 %v1354_v25 }
  0xc1   :  { %559 = vmatpush1.bf16.msra.mxu0 %v1352_v26 }
  0xc2   :  { %560 = vmatprep.subr.bf16.mxu0 %v1358_v27 }
  0xc5   :  { %561 = vmatpush1.bf16.msra.mxu0 %v1356_v28 }
  0xc6   :  { %562 = vmatprep.subr.bf16.mxu0 %v1362_v29 }
  0xc9   :  { %563 = vmatpush1.bf16.msra.mxu0 %v1360_v30 }
  0xca   :  { %564 = vmatprep.subr.bf16.mxu0 %v1366_v31 }
  0xcd   :  { %565 = vmatpush1.bf16.msra.mxu0 %v1364_v32 }
  0xce   :  { %566 = vmatprep.subr.bf16.mxu0 %v1370_v48 }
  0xd1   :  { %567 = vmatpush1.bf16.msra.mxu0 %v1368_v49 }
  0xd2   :  { %1245 = vmatprep.subr.bf16.mxu0 %v1700_v0 }
 0x187   :  { %v254_v34 = vpop.f32.mrb[0].mxu0 }
 0x188   :  { %v255_v35 = vadd.f32 %v1059_v33, %v254_v34  ;;  %v1203_v36 = vpop.f32.mrb[1].mxu0 }
 0x189   :  { %v257_v37 = vpop.f32.mrb[2].mxu0  ;;  %v145_v36 = vld [vmem:[#allocation5] sm:$0xff] }
 0x18a   :  { %v260_v38 = vmax.f32 %v255_v35, 0.0  ;;  %v1204_v39 = vpop.f32.mrb[3].mxu0  ;;  %v146_v35 = vld [vmem:[#allocation5 + $0x8] sm:$0xff] }
 0x18c   :  { %v278_v41 = vpack.c.bf16 %v260_v38, %v260_v38 }
 0x18e   :  { %1222 = vmatmul.mubr.bf16.vlgmr.msra.gmra.mrb[0].mxu1 %v278_v41 }
 0x18f   :  { %1226 = vmatpush3.bf16.msra.mxu1 %v1343_v40  ;;  %1241 = vmatprep.mubr.msk.bf16.mxu1 %vm1701_vm0, %v1700_v0 }
 0x190   :  { %1227 = vmatprep.subr.bf16.mxu1 %v1700_v0 }
 0x193   :  { %1228 = vmatpush3.bf16.msra.mxu1 %v1347_v42 }
 0x194   :  { %1229 = vmatprep.subr.bf16.mxu1 %v1700_v0 }
 0x197   :  { %1230 = vmatpush3.bf16.msra.mxu1 %v1351_v43 }
 0x198   :  { %1231 = vmatprep.subr.bf16.mxu1 %v1700_v0 }
 0x19b   :  { %1232 = vmatpush3.bf16.msra.mxu1 %v1355_v44 }
 0x19c   :  { %1233 = vmatprep.subr.bf16.mxu1 %v1700_v0 }
 0x19f   :  { %1234 = vmatpush3.bf16.msra.mxu1 %v1359_v45 }
 0x1a0   :  { %1235 = vmatprep.subr.bf16.mxu1 %v1700_v0 }
 0x1a3   :  { %1236 = vmatpush3.bf16.msra.mxu1 %v1363_v46 }
 0x1a4   :  { %1237 = vmatprep.subr.bf16.mxu1 %v1700_v0 }
 0x1a7   :  { %1238 = vmatpush3.bf16.msra.mxu1 %v1367_v47 }
 0x1a8   :  { %1239 = vmatprep.subr.bf16.mxu1 %v1700_v0 }
 0x1ab   :  { %1240 = vmatpush3.bf16.msra.mxu1 %v1371_v50  ;;  %v1386_v50 = vld [vmem:[#allocation13 + $0x30] sm:$0xff]  }
 0x1ac   :  { %1265 = vmatprep.subr.bf16.mxu1 %v1700_v0 }
 0x261   :  { %v367_v53 = vpop.f32.mrb[0].mxu1 }
 0x262   :  { %v368_v54 = vadd.f32 %v1068_v52, %v367_v53  ;;  %v1223_v55 = vpop.f32.mrb[1].mxu1  ;;  %v1388_v52 = vld [vmem:[#allocation14] sm:$0xff]   ;;  %v1389_v53 = vld [vmem:[#allocation14 + $0x8] sm:$0xff]  }
 0x263   :  { %v370_v56 = vpop.f32.mrb[2].mxu1  ;;  %v1391_v55 = vld [vmem:[#allocation14 + $0x18] sm:$0xff]  }
 0x264   :  { %v373_v57 = vmax.f32 %v368_v54, 0.0  ;;  %v1224_v58 = vpop.f32.mrb[3].mxu1  ;;  %v1390_v54 = vld [vmem:[#allocation14 + $0x10] sm:$0xff]   ;;  %v1392_v56 = vld [vmem:[#allocation14 + $0x20] sm:$0xff]  }
 0x265   :  { %v1103_v58 = vld [vmem:[%s2024_s8 + $0x5] ss:$0 sm:$0xff] }
 0x266   :  { %v407_v59 = vpack.c.bf16 %v373_v57, %v373_v57  ;;  %v1393_v57 = vld [vmem:[#allocation14 + $0x28] sm:$0xff]  }
 0x268   :  { %585 = vmatmul.mubr.bf16.vlgmr.msra.gmra.mrb[4].mxu0 %v407_v59  ;;  %1242 = vmatmul.mubr.bf16.vlgmr.msra.gmra.mrb[4].mxu1 %v407_v59 }
 0x269   :  { %1261 = vmatprep.mubr.msk.bf16.mxu0 %vm1701_vm0, %v1700_v0  ;;  %1281 = vmatprep.mubr.msk.bf16.mxu1 %vm1701_vm0, %v1700_v0 }
 0x26a   :  { %1246 = vmatpush3.bf16.msra.mxu0 %v1372_v60  ;;  %1266 = vmatpush3.bf16.msra.mxu1 %v1380_v5  ;;  %v1112_v5 = vld [vmem:[%s2024_s8 + $0x6] ss:$0 sm:$0xff] }
 0x26b   :  { %1247 = vmatprep.subr.bf16.mxu0 %v1700_v0  ;;  %1267 = vmatprep.subr.bf16.mxu1 %v1700_v0 }
 0x26e   :  { %1248 = vmatpush3.bf16.msra.mxu0 %v1373_v61  ;;  %1268 = vmatpush3.bf16.msra.mxu1 %v1381_v6 }
 0x26f   :  { %1249 = vmatprep.subr.bf16.mxu0 %v1700_v0  ;;  %1269 = vmatprep.subr.bf16.mxu1 %v1700_v0 }
 0x272   :  { %1250 = vmatpush3.bf16.msra.mxu0 %v1374_v62  ;;  %1270 = vmatpush3.bf16.msra.mxu1 %v1382_v7 }
 0x273   :  { %1251 = vmatprep.subr.bf16.mxu0 %v1700_v0  ;;  %1271 = vmatprep.subr.bf16.mxu1 %v1700_v0 }
 0x276   :  { %1252 = vmatpush3.bf16.msra.mxu0 %v1375_v63  ;;  %1272 = vmatpush3.bf16.msra.mxu1 %v1383_v8 }
 0x277   :  { %1253 = vmatprep.subr.bf16.mxu0 %v1700_v0  ;;  %1273 = vmatprep.subr.bf16.mxu1 %v1700_v0 }
 0x27a   :  { %1254 = vmatpush3.bf16.msra.mxu0 %v1376_v1  ;;  %1274 = vmatpush3.bf16.msra.mxu1 %v1384_v9 }
 0x27b   :  { %1255 = vmatprep.subr.bf16.mxu0 %v1700_v0  ;;  %1275 = vmatprep.subr.bf16.mxu1 %v1700_v0 }
 0x27e   :  { %1256 = vmatpush3.bf16.msra.mxu0 %v1377_v2  ;;  %1276 = vmatpush3.bf16.msra.mxu1 %v1385_v10 }
 0x27f   :  { %1257 = vmatprep.subr.bf16.mxu0 %v1700_v0  ;;  %1277 = vmatprep.subr.bf16.mxu1 %v1700_v0 }
 0x282   :  { %1258 = vmatpush3.bf16.msra.mxu0 %v1378_v3  ;;  %1278 = vmatpush3.bf16.msra.mxu1 %v1386_v50  ;;  %v1394_v3 = vld [vmem:[#allocation14 + $0x30] sm:$0xff]  }
 0x283   :  { %1259 = vmatprep.subr.bf16.mxu0 %v1700_v0  ;;  %1279 = vmatprep.subr.bf16.mxu1 %v1700_v0 }
 0x286   :  { %1260 = vmatpush3.bf16.msra.mxu0 %v1379_v4  ;;  %1280 = vmatpush3.bf16.msra.mxu1 %v1387_v51  ;;  %v1395_v4 = vld [vmem:[#allocation14 + $0x38] sm:$0xff]  }
 0x287   :  { %1285 = vmatprep.subr.bf16.mxu0 %v1700_v0 }
 0x33b   :  { %v586_v20 = vpop.f32.mrb[4].mxu0  ;;  %v627_v21 = vpop.f32.mrb[4].mxu1 }
 0x33c   :  { %v587_v22 = vadd.f32 %v586_v20, %v412_v17  ;;  %v628_v23 = vadd.f32 %v627_v21, %v420_v18  ;;  %v588_v24 = vpop.f32.mrb[5].mxu0  ;;  %v1243_v25 = vpop.f32.mrb[5].mxu1 }
 0x33d   :  { %v589_v26 = vadd.f32 %v588_v24, %v416_v19  ;;  %v590_v27 = vpop.f32.mrb[6].mxu0  ;;  %v630_v28 = vpop.f32.mrb[6].mxu1 }
 0x33e   :  { %634 = vst [vmem:[#allocation16] sm:$0xff] %v587_v22  ;;  %v633_v29 = vmin.f32 %v628_v23, 0.0  ;;  %v591_v30 = vpop.f32.mrb[7].mxu0  ;;  %v1244_v31 = vpop.f32.mrb[7].mxu1 }
 0x33f   :  { %v637_v32 = vmul.f32 0.5, %v589_v26  ;;  %635 = vst [vmem:[#allocation17] sm:$0xff] %v589_v26 }
 0x340   :  { %636 = vst [vmem:[#allocation19] sm:$0xff] %v633_v29  ;;  %v642_v33 = vmul.f32 1.442695, %v633_v29 }
 0x341   :  { %v638_v34 = vmul.f32 1.442695, %v637_v32 }
 0x342   :  { %1396 = vpow2.f32 %v642_v33 }
 0x343   :  { %1398 = vpow2.f32 %v638_v34 }
 0x34c   :  { %v1397_v37 = vpop.eup %1396 }
 0x34d   :  { %v1399_v38 = vpop.eup %1398  ;;  %v644_v39 = vadd.f32 %v1397_v37, %v146_v35 }
 0x34e   :  { %v640_v40 = vmul.f32 %v1399_v38, %v145_v36 }
 0x34f   :  { %v1101_v41 = vadd.f32 -1.0, %v644_v39 }
 0x350   :  { %v641_v42 = vadd.f32 %v640_v40, %v587_v22 }
 0x351   :  { %v1102_v43 = vmul.f32 -50.0, %v1101_v41 }
 0x353   :  { %v648_v44 = vmul.f32 1.442695, %v1102_v43 }
 0x355   :  { %1400 = vpow2.f32 %v648_v44 }
 0x35f   :  { %v1401_v45 = vpop.eup %1400 }
 0x360   :  { %v650_v46 = vadd.f32 1.0, %v1401_v45 }
 0x362   :  { %1402 = vrcp.f32 %v650_v46 }
 0x36c   :  { %v1403_v47 = vpop.eup %1402 }
 0x36d   :  { %v653_v48 = vmul.f32 %v1403_v47, %v641_v42 }
 0x36f   :  { %v671_v49 = vpack.c.bf16 %v653_v48, %v653_v48 }
 0x371   :  { %1262 = vmatmul.mubr.bf16.vlgmr.msra.gmra.mrb[8].mxu0 %v671_v49 }
 0x372   :  { %1301 = vmatprep.mubr.msk.bf16.mxu0 %vm1701_vm0, %v1700_v0  ;;  %1286 = vmatpush3.bf16.msra.mxu0 %v1388_v52 }
 0x373   :  { %1287 = vmatprep.subr.bf16.mxu0 %v1700_v0 }
 0x376   :  { %1288 = vmatpush3.bf16.msra.mxu0 %v1389_v53 }
 0x377   :  { %1289 = vmatprep.subr.bf16.mxu0 %v1700_v0 }
 0x37a   :  { %1290 = vmatpush3.bf16.msra.mxu0 %v1390_v54 }
 0x37b   :  { %1291 = vmatprep.subr.bf16.mxu0 %v1700_v0 }
 0x37e   :  { %1292 = vmatpush3.bf16.msra.mxu0 %v1391_v55 }
 0x37f   :  { %1293 = vmatprep.subr.bf16.mxu0 %v1700_v0 }
 0x382   :  { %1294 = vmatpush3.bf16.msra.mxu0 %v1392_v56 }
 0x383   :  { %1295 = vmatprep.subr.bf16.mxu0 %v1700_v0 }
 0x386   :  { %1296 = vmatpush3.bf16.msra.mxu0 %v1393_v57 }
 0x387   :  { %1297 = vmatprep.subr.bf16.mxu0 %v1700_v0 }
 0x38a   :  { %1298 = vmatpush3.bf16.msra.mxu0 %v1394_v3 }
 0x38b   :  { %1299 = vmatprep.subr.bf16.mxu0 %v1700_v0 }
 0x38e   :  { %1300 = vmatpush3.bf16.msra.mxu0 %v1395_v4 }
 0x444   :  { %v760_v59 = vpop.f32.mrb[8].mxu0 }
 0x445   :  { %v761_v60 = vadd.f32 %v1103_v58, %v760_v59  ;;  %v1263_v61 = vpop.f32.mrb[9].mxu0 }
 0x446   :  { %v763_v62 = vpop.f32.mrb[10].mxu0 }
 0x447   :  { %v766_v63 = vmax.f32 %v761_v60, 0.0  ;;  %v1264_v1 = vpop.f32.mrb[11].mxu0 }
 0x449   :  { %v784_v2 = vpack.c.bf16 %v766_v63, %v766_v63 }
 0x44b   :  { %1282 = vmatmul.mubr.bf16.vlgmr.msra.gmra.mrb[8].mxu1 %v784_v2 }
 0x51e   :  { %v873_v6 = vpop.f32.mrb[8].mxu1 }
 0x51f   :  { %v874_v7 = vadd.f32 %v1112_v5, %v873_v6  ;;  %v1283_v8 = vpop.f32.mrb[9].mxu1 }
 0x520   :  { %v876_v9 = vpop.f32.mrb[10].mxu1 }
 0x521   :  { %v879_v10 = vmax.f32 %v874_v7, 0.0  ;;  %v1284_v11 = vpop.f32.mrb[11].mxu1 }
 0x523   :  { %v897_v12 = vpack.c.bf16 %v879_v10, %v879_v10 }
 0x525   :  { %1302 = vmatmul.mubr.bf16.vlgmr.msra.gmra.mrb[12].mxu0 %v897_v12 }
 0x526   :  { %1595 = shalt.err (!%p1592_p12)
}
 0x527   :  { %s1596_s18 = scalar_lea.hbm %s2026_s10, 128 }
 0x528   :  { %p1597_p13 = scmp.ne.s32.totalorder %s2026_s10, %s1596_s18  ;;  %p1600_p0 = scmp.lt.u32.totalorder %s1596_s18, %s2026_s10 }
 0x52a   :  { %p1602_p1 = pnand %p1600_p0, %p1597_p13 }
 0x52c   :  { %1605 = shalt.err (!%p1602_p1)
}
 0x52d   :  { %1018 = dma.vmem_to_hbm [thread:$0]  %s1016_s13, 128, %s2026_s10, [#allocation18]  }
 0x52e   :  { %s1606_s6 = scalar_lea.vmem %s1006_s4, 128  ;;  %p1611_p3 = scmp.lt.s32.totalorder %s1006_s4, %s1006_s4 }
 0x52f   :  { %p1607_p2 = scmp.ne.s32.totalorder %s1006_s4, %s1606_s6  ;;  %p1612_p4 = scmp.lt.s32.totalorder %s1606_s6, %s1606_s6 }
 0x531   :  { %p1613_p5 = por %p1612_p4, %p1611_p3 }
 0x533   :  { %p1614_p6 = pnand %p1613_p5, %p1607_p2 }
 0x535   :  { %1617 = shalt.err (!%p1614_p6)
}
 0x536   :  { %s1618_s22 = scalar_lea.hbm %s2025_s9, 128 }
 0x537   :  { %p1619_p7 = scmp.ne.s32.totalorder %s2025_s9, %s1618_s22  ;;  %p1622_p8 = scmp.lt.u32.totalorder %s1618_s22, %s2025_s9 }
 0x539   :  { %p1624_p9 = pnand %p1622_p8, %p1619_p7 }
 0x53b   :  { %1627 = shalt.err (!%p1624_p9)
}
 0x53c   :  { %1008 = dma.vmem_to_hbm [thread:$0]  %s1006_s4, 128, %s2025_s9, [#allocation4]  }
 0x53d   :  { %s1705_s0 = smov [#allocation19]  }
 0x53e   :  { %s1025_s24 = sshll.u32 %s1705_s0, 4  ;;  %s1026_s24 = int_to_ptr.vmem [resolvable:$true] %s1025_s24 }
 0x53f   :  { %s1628_s28 = scalar_lea.vmem %s1026_s24, 128  ;;  %p1633_p11 = scmp.lt.s32.totalorder %s1026_s24, %s1026_s24 }
 0x540   :  { %p1629_p10 = scmp.ne.s32.totalorder %s1026_s24, %s1628_s28  ;;  %p1634_p12 = scmp.lt.s32.totalorder %s1628_s28, %s1628_s28 }
 0x542   :  { %p1635_p13 = por %p1634_p12, %p1633_p11 }
 0x544   :  { %p1636_p0 = pnand %p1635_p13, %p1629_p10 }
 0x546   :  { %1639 = shalt.err (!%p1636_p0)
}
 0x547   :  { %s1640_s14 = scalar_lea.hbm %s2027_s11, 128 }
 0x548   :  { %p1641_p1 = scmp.ne.s32.totalorder %s2027_s11, %s1640_s14  ;;  %p1644_p2 = scmp.lt.u32.totalorder %s1640_s14, %s2027_s11 }
 0x54a   :  { %p1646_p3 = pnand %p1644_p2, %p1641_p1 }
 0x54c   :  { %1649 = shalt.err (!%p1646_p3)
}
 0x54d   :  { %1028 = dma.vmem_to_hbm [thread:$0]  %s1026_s24, 128, %s2027_s11, [#allocation18]   ;;  %v1121_v0 = vld [vmem:[%s2024_s8 + $0x7] ss:$0 sm:$0xff] }
 0x54e   :  { %s1706_s2 = smov [#allocation20]  }
 0x54f   :  { %s1035_s26 = sshll.u32 %s1706_s2, 4  ;;  %s1036_s26 = int_to_ptr.vmem [resolvable:$true] %s1035_s26 }
 0x550   :  { %s1650_s11 = scalar_lea.vmem %s1036_s26, 128  ;;  %p1655_p5 = scmp.lt.s32.totalorder %s1036_s26, %s1036_s26 }
 0x551   :  { %p1651_p4 = scmp.ne.s32.totalorder %s1036_s26, %s1650_s11  ;;  %p1656_p6 = scmp.lt.s32.totalorder %s1650_s11, %s1650_s11 }
 0x553   :  { %p1657_p7 = por %p1656_p6, %p1655_p5 }
 0x555   :  { %p1658_p8 = pnand %p1657_p7, %p1651_p4 }
 0x5f8   :  { %v986_v13 = vpop.f32.mrb[12].mxu0 }
 0x5f9   :  { %v987_v14 = vadd.f32 %v1121_v0, %v986_v13  ;;  %v1303_v15 = vpop.f32.mrb[13].mxu0 }
 0x5fa   :  { %v989_v16 = vpop.f32.mrb[14].mxu0 }
 0x5fb   :  { %v1130_v17 = vmul.f32 -1.442695, %v987_v14  ;;  %v1304_v18 = vpop.f32.mrb[15].mxu0 }
 0x5fd   :  { %1404 = vpow2.f32 %v1130_v17 }
 0x607   :  { %v1405_v19 = vpop.eup %1404 }
 0x608   :  { %v995_v20 = vadd.f32 1.0, %v1405_v19 }
 0x60a   :  { %1406 = vrcp.f32 %v995_v20 }
 0x614   :  { %v1407_v21 = vpop.eup %1406 }
 0x615   :  { %998 = vst [vmem:[#allocation20] sm:$0xff] %v1407_v21 }
 0x616   :  { %1661 = shalt.err (!%p1658_p8)
}
 0x617   :  { %s1662_s21 = scalar_lea.hbm %s2028_s12, 128 }
 0x618   :  { %p1663_p9 = scmp.ne.s32.totalorder %s2028_s12, %s1662_s21  ;;  %p1666_p10 = scmp.lt.u32.totalorder %s1662_s21, %s2028_s12 }
 0x61a   :  { %p1668_p11 = pnand %p1666_p10, %p1663_p9 }
 0x61c   :  { %1671 = shalt.err (!%p1668_p11)
}
 0x61d   :  { %1038 = dma.vmem_to_hbm [thread:$0]  %s1036_s26, 128, %s2028_s12, [#allocation21]  }
 0x61e   :  { %1682 = dma.done.wait [#allocation4], 128  }
 0x61f   :  { %1683 = vsyncadd [#allocation4], 4294967168 }
 0x620   :  { %1684 = dma.done.wait [#allocation18], 256  }
 0x621   :  { %1685 = vsyncadd [#allocation18], 4294967040 }
 0x622   :  { %1686 = dma.done.wait [#allocation21], 128  }
 0x623   :  { %1687 = vsyncadd [#allocation21], 4294967168 }
 0x624   :  { %1051 = vsyncpa [#allocation3], 1 }
 0x625   :  { %1052 = vsyncpa [#allocation6], 1 }
 0x626   :  { %1053 = vsyncpa [#allocation9], 1 }
 0x627   :  { %1054 = vsyncpa [#allocation12], 1 }
 0x628   :  { %1055 = vsyncpa [#allocation15], 1 }
 0x629   :  { %1056 = vsyncpa [#allocation4], 1 }
 0x62a   :  { %1057 = vsyncpa [#allocation18], 1 }
 0x62b   :  { %1058 = vsyncpa [#allocation21], 1 }

</bundles_post_ra>
